<compile_context>
chip_gen: v5e
topology: v5e:2x2
jax: 0.10.0
libtpu: 0.0.40
codegen_flags: <defaults>
</compile_context>

<pallas_src>
import jax
import jax.numpy as jnp
from jax.experimental import pallas as pl
from jax.experimental.pallas import tpu as pltpu


def _round_up(v, m):
    return ((v + m - 1) // m) * m


def gaussian_kernel(x_ref, w_ref, cnormt_ref, nisig2_ref, o_ref):
    # x_ref:      (TB, D)  batch tile, f32
    # w_ref:      (D, TO)  -2 * centres^T  (bf16 or f32, pre-scaled in wrapper)
    # cnormt_ref: (1, TO)  -||c||^2 / sigma^2, f32
    # nisig2_ref: (1, TO)  -1 / sigma^2, f32
    # o_ref:      (TB, TO) lane-dense output tile
    x = x_ref[...]                                             # (TB, D) f32
    w = w_ref[...]                                             # (D, TO)
    xm = x.astype(w.dtype) if w.dtype != x.dtype else x        # cast only matmul operand
    xc = jnp.dot(xm, w, preferred_element_type=jnp.float32)    # (TB, TO) = -2 x.c  (MXU)
    x_norm = jnp.sum(x * x, axis=-1, keepdims=True)            # (TB, 1)  f32 (XLU)
    e = (x_norm + xc) * nisig2_ref[...] + cnormt_ref[...]      # = -||x-c||^2 / sigma^2
    e = jnp.minimum(e, 0.0)                                    # cancellation guard
    o_ref[...] = jnp.exp(e).astype(o_ref.dtype)


def gaussian_layer(x, centres, sigmas, *, tb=512, bf16_dot=True, out_dtype=jnp.float32):
    """x: (B, D) f32; centres: (O, D) f32; sigmas: (O,) f32 -> (B, O) out_dtype."""
    x = x.astype(jnp.float32)
    centres = centres.astype(jnp.float32)
    sigmas = sigmas.astype(jnp.float32)

    B, D = x.shape
    O, D2 = centres.shape
    assert D == D2

    # --- Lane-dense output: pad O to a multiple of 128 (no-op if already aligned). ---
    O_pad = _round_up(O, 128)
    if O_pad != O:
        centres = jnp.pad(centres, ((0, O_pad - O), (0, 0)))            # zero centres
        sigmas = jnp.pad(sigmas, (0, O_pad - O), constant_values=1.0)   # sigma=1 (safe)

    # --- Loop-invariant precompute (amortized over all batch tiles). ---
    w = (-2.0) * jnp.transpose(centres)                                  # (D, O_pad)
    if bf16_dot:
        w = w.astype(jnp.bfloat16)                                       # cast ONCE here
    neg_inv_sig2 = (-1.0 / (sigmas * sigmas)).reshape(1, O_pad)          # (1, O_pad)
    cnorm_term = jnp.sum(centres * centres, axis=-1).reshape(1, O_pad) * neg_inv_sig2

    # --- Tile selection under a generation-aware VMEM budget. ---
    try:
        vmem_cap = int(pltpu.get_tpu_info().vmem_capacity_bytes)
    except Exception:
        vmem_cap = 64 * 1024 * 1024
    # ~40 MiB on 64 MiB parts (v7x), capped at 64 MiB on 128 MiB parts (v5e/v6e).
    vmem_ceiling = max(16 << 20, min((vmem_cap * 5) // 8, 64 << 20))

    tb = max(8, min(int(tb), _round_up(B, 8)))
    tb = (tb // 8) * 8
    to = O_pad

    w_item = 2 if bf16_dot else 4
    out_item = jnp.dtype(out_dtype).itemsize

    def footprint(tb_, to_):
        wt = w_item * D * to_ + 4 * 2 * to_      # weights + per-O vectors
        xb = 4 * tb_ * D                         # x tile
        ob = out_item * tb_ * to_                # out tile
        return 2 * (wt + xb + ob)                # everything is double-buffered

    while footprint(tb, to) + (2 << 20) > vmem_ceiling and to > 128:
        to = max(128, _round_up(to // 2, 128))
    while footprint(tb, to) + (2 << 20) > vmem_ceiling and tb > 8:
        tb = max(8, ((tb // 2) // 8) * 8)

    nb = pl.cdiv(B, tb)          # ragged last batch block: OOB writes are masked
    no = pl.cdiv(O_pad, to)

    vmem_limit = int(min(max(footprint(tb, to) + (4 << 20), 16 << 20), vmem_ceiling))

    out = pl.pallas_call(
        gaussian_kernel,
        out_shape=jax.ShapeDtypeStruct((B, O_pad), out_dtype),
        grid_spec=pltpu.PrefetchScalarGridSpec(
            num_scalar_prefetch=0,
            grid=(nb, no),
            in_specs=[
                pl.BlockSpec((tb, D), lambda i, j: (i, 0)),   # x tile (resident across j)
                pl.BlockSpec((D, to), lambda i, j: (0, j)),   # -2 * centres^T
                pl.BlockSpec((1, to), lambda i, j: (0, j)),   # -||c||^2 / sigma^2
                pl.BlockSpec((1, to), lambda i, j: (0, j)),   # -1 / sigma^2
            ],
            out_specs=pl.BlockSpec((tb, to), lambda i, j: (i, j)),
        ),
        compiler_params=pltpu.CompilerParams(
            dimension_semantics=("parallel", "parallel"),
            vmem_limit_bytes=vmem_limit,
        ),
    )(x, w, cnorm_term, neg_inv_sig2)

    if O_pad != O:
        out = out[:, :O]
    return out


def gaussian_layer_ref(x, centres, sigmas):
    diff = x[:, None, :] - centres[None, :, :]
    d = jnp.sqrt(jnp.sum(diff * diff, axis=-1)) / sigmas[None, :]
    return jnp.exp(-(d * d))


if __name__ == "__main__":
    key = jax.random.PRNGKey(0)
    kx, kc, kx2, kc2, ks2 = jax.random.split(key, 5)

    # Small shapes consistent with the module.
    B, in_features, out_features = 16, 32, 128
    x = jax.random.normal(kx, (B, in_features), dtype=jnp.float32)
    # reset_parameters(): centres ~ U(-1, 1), sigmas = 1
    centres = jax.random.uniform(
        kc, (out_features, in_features), dtype=jnp.float32, minval=-1.0, maxval=1.0
    )
    sigmas = jnp.ones((out_features,), dtype=jnp.float32)

    ref = gaussian_layer_ref(x, centres, sigmas)

    # f32 MXU path: tight tolerance.
    out_f32 = jax.block_until_ready(gaussian_layer(x, centres, sigmas, bf16_dot=False))
    assert out_f32.shape == (B, out_features)
    assert jnp.allclose(out_f32, ref, atol=2e-5, rtol=1e-4)

    # Default bf16-operand MXU path: looser tolerance (bf16 cross term in the
    # cancellation-prone distance decomposition).
    out_bf16 = jax.block_until_ready(gaussian_layer(x, centres, sigmas))
    assert out_bf16.shape == (B, out_features)
    assert jnp.allclose(out_bf16, ref, atol=2e-2, rtol=1e-2)

    # Ragged batch (no wrapper pad/slice), non-128-multiple O (padded to lane-dense),
    # non-unit sigmas, bf16 output path.
    B2, D2, O2 = 300, 24, 200
    x2 = jax.random.normal(kx2, (B2, D2), dtype=jnp.float32)
    c2 = jax.random.uniform(kc2, (O2, D2), dtype=jnp.float32, minval=-1.0, maxval=1.0)
    s2 = jax.random.uniform(ks2, (O2,), dtype=jnp.float32, minval=0.5, maxval=1.5)
    ref2 = gaussian_layer_ref(x2, c2, s2)
    out2 = jax.block_until_ready(
        gaussian_layer(x2, c2, s2, tb=128, out_dtype=jnp.bfloat16)
    )
    assert out2.shape == (B2, O2)
    assert jnp.allclose(out2.astype(jnp.float32), ref2, atol=3e-2, rtol=3e-2)

    print("KERNEL_OK")
</pallas_src>

<mosaic_0001>
module attributes {stable_mosaic.version = 11 : i64} {
  func.func @gaussian_kernel(%arg0: i32, %arg1: i32, %arg2: memref<16x32xf32, #tpu.memory_space<vmem>>, %arg3: memref<32x128xf32, #tpu.memory_space<vmem>>, %arg4: memref<1x128xf32, #tpu.memory_space<vmem>>, %arg5: memref<1x128xf32, #tpu.memory_space<vmem>>, %arg6: memref<16x128xf32, #tpu.memory_space<vmem>>) attributes {dimension_semantics = [#tpu.dimension_semantics<parallel>, #tpu.dimension_semantics<parallel>], iteration_bounds = array<i64: 1, 1>, scalar_prefetch = 0 : i64, scratch_operands = 0 : i64, tpu.core_type = #tpu.core_type<tc>, window_params = [{transform_indices = @transform_0, window_bounds = array<i64: 16, 32>}, {transform_indices = @transform_1, window_bounds = array<i64: 32, 128>}, {transform_indices = @transform_2, window_bounds = array<i64: 1, 128>}, {transform_indices = @transform_3, window_bounds = array<i64: 1, 128>}, {transform_indices = @transform_4, window_bounds = array<i64: 16, 128>}]} {
    %c0 = arith.constant 0 : index
    %c0_0 = arith.constant 0 : index
    %0 = vector.load %arg2[%c0, %c0_0] : memref<16x32xf32, #tpu.memory_space<vmem>>, vector<16x32xf32>
    %c0_1 = arith.constant 0 : index
    %c0_2 = arith.constant 0 : index
    %1 = vector.load %arg3[%c0_1, %c0_2] : memref<32x128xf32, #tpu.memory_space<vmem>>, vector<32x128xf32>
    %cst = arith.constant dense<0.000000e+00> : vector<16x128xf32>
    %2 = tpu.matmul %0, %1, %cst {dimension_numbers = #tpu.dot_dimension_numbers<[1], [0], [0], [1], [0, 0, 1, 1], [], []>} : vector<16x32xf32>, vector<32x128xf32>, vector<16x128xf32> -> vector<16x128xf32>
    %3 = arith.mulf %0, %0 : vector<16x32xf32>
    %cst_3 = arith.constant dense<0.000000e+00> : vector<16xf32>
    %4 = vector.multi_reduction <add>, %3, %cst_3 [1] : vector<16x32xf32> to vector<16xf32>
    %5 = vector.shape_cast %4 : vector<16xf32> to vector<16x1xf32>
    %6 = vector.broadcast %5 : vector<16x1xf32> to vector<16x128xf32>
    %7 = arith.addf %6, %2 : vector<16x128xf32>
    %c0_4 = arith.constant 0 : index
    %c0_5 = arith.constant 0 : index
    %8 = vector.load %arg5[%c0_4, %c0_5] : memref<1x128xf32, #tpu.memory_space<vmem>>, vector<1x128xf32>
    %9 = vector.broadcast %8 : vector<1x128xf32> to vector<16x128xf32>
    %10 = arith.mulf %7, %9 : vector<16x128xf32>
    %c0_6 = arith.constant 0 : index
    %c0_7 = arith.constant 0 : index
    %11 = vector.load %arg4[%c0_6, %c0_7] : memref<1x128xf32, #tpu.memory_space<vmem>>, vector<1x128xf32>
    %12 = vector.broadcast %11 : vector<1x128xf32> to vector<16x128xf32>
    %13 = arith.addf %10, %12 : vector<16x128xf32>
    %cst_8 = arith.constant 0.000000e+00 : f32
    %14 = vector.broadcast %cst_8 : f32 to vector<16x128xf32>
    %15 = arith.minimumf %13, %14 : vector<16x128xf32>
    %16 = math.exp %15 : vector<16x128xf32>
    %c0_9 = arith.constant 0 : index
    %c0_10 = arith.constant 0 : index
    %17 = vector.load %arg6[%c0_9, %c0_10] : memref<16x128xf32, #tpu.memory_space<vmem>>, vector<16x128xf32>
    tpu.vector_store %arg6[%c0_9, %c0_10], %16 {strides = array<i32>} : memref<16x128xf32, #tpu.memory_space<vmem>>, vector<16x128xf32>,
    return
  }
  func.func @transform_0(%arg0: i32, %arg1: i32) -> (i32, i32) {
    %c0_i32 = arith.constant 0 : i32
    %c0_i32_0 = arith.constant 0 : i32
    return %arg0, %c0_i32 : i32, i32
  }
  func.func @transform_1(%arg0: i32, %arg1: i32) -> (i32, i32) {
    %c0_i32 = arith.constant 0 : i32
    %c0_i32_0 = arith.constant 0 : i32
    return %c0_i32, %arg1 : i32, i32
  }
  func.func @transform_2(%arg0: i32, %arg1: i32) -> (i32, i32) {
    %c0_i32 = arith.constant 0 : i32
    %c0_i32_0 = arith.constant 0 : i32
    return %c0_i32, %arg1 : i32, i32
  }
  func.func @transform_3(%arg0: i32, %arg1: i32) -> (i32, i32) {
    %c0_i32 = arith.constant 0 : i32
    %c0_i32_0 = arith.constant 0 : i32
    return %c0_i32, %arg1 : i32, i32
  }
  func.func @transform_4(%arg0: i32, %arg1: i32) -> (i32, i32) {
    %c0_i32 = arith.constant 0 : i32
    return %arg0, %arg1 : i32, i32
  }
}

</mosaic_0001>

<bundles_post_ra>
// kernel: tpu_custom_call.1
= control target key start
LH: loop header
LB: loop body
LE: loop exit
PB: predicated region body
PF: predicated region fallthrough
CT: control target
= control target key end

     0   :  { %9 = vsyncpa [#allocation3], 0  ;;  %s289_s0 = inlined_call_operand.hbm [shape: f32[16,32], index: 0, kind: input, shape index: {}]   ;;  %s290_s1 = inlined_call_operand.hbm [shape: f32[32,128], index: 1, kind: input, shape index: {}]   ;;  %s291_s2 = inlined_call_operand.vmem [shape: f32[1,128], index: 2, kind: input, shape index: {}]   ;;  %s292_s3 = inlined_call_operand.vmem [shape: f32[1,128], index: 3, kind: input, shape index: {}]   ;;  %s293_s4 = inlined_call_operand.hbm [shape: f32[16,128], index: 4, kind: output, shape index: {}]  }
   0x1   :  { %10 = vsyncpa [#allocation6], 0 }
   0x2   :  { %11 = vsyncpa [#allocation4], 0  ;;  %s16_s17 = sshll.u32 %s289_s0, 4  ;;  %s231_s18 = smov [#allocation2]   ;;  %s17_s17 = int_to_ptr.hbm [resolvable:$true] %s16_s17 }
   0x3   :  { %s18_s19 = sshll.u32 %s231_s18, 4  ;;  %s29_s22 = sshll.u32 %s290_s1, 4  ;;  %s19_s19 = int_to_ptr.vmem [resolvable:$true] %s18_s19  ;;  %s30_s22 = int_to_ptr.hbm [resolvable:$true] %s29_s22 }
   0x4   :  { %s232_s23 = smov 128   ;;  %s233_s24 = smov 8  }
   0x5   :  { %24 = dma.hbm_to_vmem [thread:$0]  %s17_s17, 256, %s19_s19, [#allocation3], %s232_s23, %s232_s23, %s233_s24  }
   0x6   :  { %s234_s25 = smov [#allocation5]  }
   0x7   :  { %s31_s26 = sshll.u32 %s234_s25, 4  ;;  %s32_s26 = int_to_ptr.vmem [resolvable:$true] %s31_s26 }
   0x8   :  { %37 = dma.hbm_to_vmem [thread:$0]  %s30_s22, 512, %s32_s26, [#allocation6], %s232_s23, %s232_s23, %s233_s24  }
   0x9   :  { %225 = dma.done.wait [#allocation3], 256  }
   0xa   :  { %226 = vsyncadd [#allocation3], 4294967040 }
   0xb   :  { %227 = dma.done.wait [#allocation6], 512  }
   0xc   :  { %228 = vsyncadd [#allocation6], 4294966784  ;;  %v55_v0 = vld [vmem:[#allocation5 + $0x18] sm:$0xff]  ;;  %v54_v1 = vld [vmem:[#allocation5 + $0x10] sm:$0xff]  ;;  %vm56_vm0 = vcmask 261120   ;;  %s235_s29 = smov [#allocation7]  }
   0xd   :  { %75 = vmatpush.msra.mxu0 %v55_v0  ;;  %138 = vmatpush.msra.mxu1 %v55_v0  ;;  %v50_v2 = vld [vmem:[#allocation2] sm:$0xff]  ;;  %v53_v3 = vld [vmem:[#allocation5 + $0x8] sm:$0xff]  ;;  %v52_v5 = vld [vmem:[#allocation5] sm:$0xff]  ;;  %s122_s6 = sshll.u32 %s293_s4, 4  ;;  %s123_s6 = int_to_ptr.hbm [resolvable:$true] %s122_s6 }
   0xe   :  { %v86_v4 = vmul.f32 %v50_v2, %v50_v2  ;;  %v51_v7 = vld [vmem:[#allocation2 + $0x8] sm:$0xff]  ;;  %v147_v12 = vld [vmem:[%s292_s3] ss:$0 sm:$0xff]  ;;  %s120_s3 = sshll.u32 %s235_s29, 4  ;;  %s121_s3 = int_to_ptr.vmem [resolvable:$true] %s120_s3 }
   0xf   :  { %76 = vmatpush.msra.mxu0 %v54_v1  ;;  %139 = vmatpush.msra.mxu1 %v54_v1  ;;  %v87_v8 = vmul.f32 %v51_v7, %v51_v7  ;;  %v148_v15 = vld [vmem:[%s291_s2] ss:$0 sm:$0xff] }
  0x10   :  { %v88_v6 = vsel %vm56_vm0, %v86_v4, 0.0 }
  0x11   :  { %77 = vmatpush.msra.mxu0 %v53_v3  ;;  %140 = vmatpush.msra.mxu1 %v53_v3  ;;  %v91_v9 = vsel %vm56_vm0, %v87_v8, 0.0 }
  0x12   :  { %89 = vadd.xlane.f32.xlu0 %v88_v6 }
  0x13   :  { %78 = vmatpush.msra.mxu0 %v52_v5  ;;  %141 = vmatpush.msra.mxu1 %v52_v5 }
  0x14   :  { %136 = vmatmul.msk.f32.vlgmr.msra.gmra.mxu0 %vm56_vm0, %v50_v2  ;;  %137 = vmatmul.msk.f32.vlgmr.msra.gmra.mxu1 %vm56_vm0, %v51_v7 }
  0x1a   :  { %92 = vadd.xlane.f32.xlu0 %v91_v9 }
  0x85   :  { %v90_v10 = vpop.xlane.xlu0 %89 }
  0x8d   :  { %v93_v11 = vpop.xlane.xlu0 %92 }
  0x91   :  { %v83_v13 = vpop.f32.mrf.mxu1  ;;  %v80_v14 = vpop.f32.mrf.mxu0 }
  0x92   :  { %v95_v16 = vadd.f32 %v93_v11, %v83_v13  ;;  %v94_v17 = vadd.f32 %v90_v10, %v80_v14 }
  0x94   :  { %v101_v18 = vmul.f32 %v147_v12, %v95_v16  ;;  %v100_v19 = vmul.f32 %v147_v12, %v94_v17 }
  0x96   :  { %v107_v20 = vadd.f32 %v148_v15, %v101_v18  ;;  %v106_v21 = vadd.f32 %v148_v15, %v100_v19 }
  0x98   :  { %v109_v22 = vmin.f32 %v107_v20, 0.0  ;;  %v108_v23 = vmin.f32 %v106_v21, 0.0 }
  0x9a   :  { %v112_v24 = vmul.f32 1.442695, %v109_v22  ;;  %v110_v25 = vmul.f32 1.442695, %v108_v23 }
  0x9c   :  { %149 = vpow2.f32 %v112_v24 }
  0x9d   :  { %151 = vpow2.f32 %v110_v25 }
  0xa2   :  { %v150_v26 = vpop.eup %149 }
  0xa3   :  { %v152_v27 = vpop.eup %151  ;;  %115 = vst [vmem:[#allocation7 + $0x8] sm:$0xff] %v150_v26 }
  0xa4   :  { %114 = vst [vmem:[#allocation7] sm:$0xff] %v152_v27 }
  0xa5   :  { %128 = dma.vmem_to_hbm [thread:$0]  %s121_s3, 256, %s123_s6, [#allocation4], %s232_s23, %s232_s23, %s233_s24  }
  0xa6   :  { %229 = dma.done.wait [#allocation4], 256  }
  0xa7   :  { %230 = vsyncadd [#allocation4], 4294967040 }
  0xa8   :  { %133 = vsyncpa [#allocation3], 1 }
  0xa9   :  { %134 = vsyncpa [#allocation6], 1 }
  0xaa   :  { %135 = vsyncpa [#allocation4], 1 }

</bundles_post_ra>
